<compile_context>
chip_gen: v5e
topology: v5e:2x2
jax: 0.10.0
libtpu: 0.0.40
codegen_flags: <defaults>
</compile_context>

<pallas_src>
import math
from functools import partial

import jax
import jax.numpy as jnp
from jax import lax
from jax.experimental import pallas as pl
from jax.experimental.pallas import tpu as pltpu


# ----------------------------- in-kernel helpers ----------------------------


def _ln_value(x, a, b, eps):
    """Custom LayerNorm on a VMEM value: a * (x - mean) / (std + eps) + b.

    std is the unbiased (correction=1) std, matching torch.Tensor.std().
    """
    d_model = x.shape[-1]
    mean = jnp.mean(x, axis=-1, keepdims=True)
    d = x - mean
    var = jnp.sum(d * d, axis=-1, keepdims=True) * (1.0 / (d_model - 1))
    std = jnp.sqrt(var)
    return a * d / (std + eps) + b


# ----------------------------- Pallas kernels ------------------------------


def _attn_sublayer_kernel(x_ref, m_ref, a_ref, b_ref, wqkv_ref, bqkv_ref,
                          wo_ref, bo_ref, o_ref, *, h, eps):
    """Fused: y = x + Wo @ MHA(LayerNorm(x), mask) for one batch element."""
    S, D = x_ref.shape[1], x_ref.shape[2]
    dk = D // h
    scale = 1.0 / math.sqrt(dk)

    x = x_ref[0].astype(jnp.float32)                       # (S, D)
    xn = _ln_value(x, a_ref[...], b_ref[...], eps)          # (S, D)

    # single fused QKV projection: one MXU pass instead of three
    qkv = jnp.dot(xn, wqkv_ref[...],
                  preferred_element_type=jnp.float32) + bqkv_ref[...]   # (S, 3D)

    mask = m_ref[0]                                          # (1, S), broadcast below

    heads = []
    for hd in range(h):                                      # static unroll over heads
        lo = hd * dk
        qh = qkv[:, lo:lo + dk]                              # (S, dk)
        kh = qkv[:, D + lo:D + lo + dk]                      # (S, dk)
        vh = qkv[:, 2 * D + lo:2 * D + lo + dk]              # (S, dk)

        # scores = q @ k^T  (contraction on dk, no explicit transpose)
        s = lax.dot_general(qh, kh, (((1,), (1,)), ((), ())),
                            preferred_element_type=jnp.float32) * scale  # (S, S)
        # broadcast (1, S) key mask over query rows; matches masked_fill(mask==0,-1e9)
        s = jnp.where(mask == 0, -1e9, s)
        s = s - jnp.max(s, axis=-1, keepdims=True)
        p = jnp.exp(s)
        p = p * pl.reciprocal(jnp.sum(p, axis=-1, keepdims=True), approx=True)
        heads.append(jnp.dot(p, vh, preferred_element_type=jnp.float32))  # (S, dk)

    attn = jnp.concatenate(heads, axis=-1)                   # (S, D) merged heads
    out = jnp.dot(attn, wo_ref[...],
                  preferred_element_type=jnp.float32) + bo_ref[...]
    o_ref[0] = (x + out).astype(o_ref.dtype)                 # residual folded in


def _ffn_sublayer_kernel(x_ref, a_ref, b_ref, w1_ref, b1_ref, w2_ref, b2_ref,
                         *rest, eps, final):
    """Fused: y = x + W2 @ relu(W1 @ LayerNorm(x)); optionally final LayerNorm."""
    if final:
        fa_ref, fb_ref, o_ref = rest
    else:
        (o_ref,) = rest

    x = x_ref[...].astype(jnp.float32)                       # (tm, D)
    xn = _ln_value(x, a_ref[...], b_ref[...], eps)
    hdn = jnp.dot(xn, w1_ref[...],
                  preferred_element_type=jnp.float32) + b1_ref[...]
    hdn = jnp.maximum(hdn, 0.0)
    ff = jnp.dot(hdn, w2_ref[...],
                 preferred_element_type=jnp.float32) + b2_ref[...]
    y = x + ff                                               # residual folded in
    if final:                                                # fused final encoder norm
        y = _ln_value(y, fa_ref[...], fb_ref[...], eps)
    o_ref[...] = y.astype(o_ref.dtype)


# ----------------------------- wrappers -------------------------------------


def attn_sublayer(x, mask, p, h, eps=1e-6):
    B, S, D = x.shape
    wqkv = jnp.concatenate([p["wq"], p["wk"], p["wv"]], axis=1)          # (D, 3D)
    bqkv = jnp.concatenate([p["bq"], p["bk"], p["bv"]]).reshape(1, 3 * D)

    return pl.pallas_call(
        partial(_attn_sublayer_kernel, h=h, eps=eps),
        out_shape=jax.ShapeDtypeStruct((B, S, D), x.dtype),
        grid=(B,),
        in_specs=[
            pl.BlockSpec((1, S, D), lambda b: (b, 0, 0)),     # x
            pl.BlockSpec((1, 1, S), lambda b: (b, 0, 0)),     # mask (no S x S blow-up)
            pl.BlockSpec((1, D), lambda b: (0, 0)),           # ln1_a
            pl.BlockSpec((1, D), lambda b: (0, 0)),           # ln1_b
            pl.BlockSpec((D, 3 * D), lambda b: (0, 0)),       # fused Wqkv
            pl.BlockSpec((1, 3 * D), lambda b: (0, 0)),       # fused bqkv
            pl.BlockSpec((D, D), lambda b: (0, 0)),           # Wo
            pl.BlockSpec((1, D), lambda b: (0, 0)),           # bo
        ],
        out_specs=pl.BlockSpec((1, S, D), lambda b: (b, 0, 0)),
        compiler_params=pltpu.CompilerParams(
            dimension_semantics=("parallel",)),
    )(x, mask, p["ln1_a"].reshape(1, D), p["ln1_b"].reshape(1, D),
      wqkv, bqkv, p["wo"], p["bo"].reshape(1, D))


def ffn_sublayer(x, p, eps=1e-6, final_norm=None, block_m=256):
    B, S, D = x.shape
    M = B * S
    x2d = x.reshape(M, D)
    d_ff = p["w1"].shape[1]

    # tile over rows; cap tile so weights + double-buffered activations stay well
    # inside VMEM even on v7x (64 MiB)
    tm = min(M, block_m)
    if M % tm != 0:
        tm = M
    grid = (M // tm,)
    final = final_norm is not None

    inputs = [x2d,
              p["ln2_a"].reshape(1, D), p["ln2_b"].reshape(1, D),
              p["w1"], p["b1"].reshape(1, d_ff),
              p["w2"], p["b2"].reshape(1, D)]
    in_specs = [
        pl.BlockSpec((tm, D), lambda i: (i, 0)),
        pl.BlockSpec((1, D), lambda i: (0, 0)),
        pl.BlockSpec((1, D), lambda i: (0, 0)),
        pl.BlockSpec((D, d_ff), lambda i: (0, 0)),
        pl.BlockSpec((1, d_ff), lambda i: (0, 0)),
        pl.BlockSpec((d_ff, D), lambda i: (0, 0)),
        pl.BlockSpec((1, D), lambda i: (0, 0)),
    ]
    if final:
        fa, fb = final_norm
        inputs += [fa.reshape(1, D), fb.reshape(1, D)]
        in_specs += [pl.BlockSpec((1, D), lambda i: (0, 0)),
                     pl.BlockSpec((1, D), lambda i: (0, 0))]

    out = pl.pallas_call(
        partial(_ffn_sublayer_kernel, eps=eps, final=final),
        out_shape=jax.ShapeDtypeStruct((M, D), x.dtype),
        grid=grid,
        in_specs=in_specs,
        out_specs=pl.BlockSpec((tm, D), lambda i: (i, 0)),
        compiler_params=pltpu.CompilerParams(
            dimension_semantics=("parallel",)),
    )(*inputs)
    return out.reshape(B, S, D)


def encoder_forward(x, mask, params, h, eps=1e-6):
    layers = params["layers"]
    n = len(layers)
    for li, p in enumerate(layers):
        x = attn_sublayer(x, mask, p, h, eps)                      # one pallas_call
        fn = (params["norm_a"], params["norm_b"]) if li == n - 1 else None
        x = ffn_sublayer(x, p, eps, final_norm=fn)                 # one pallas_call
    return x


# ----------------------------- Pure-JAX reference ---------------------------


def _ln_ref(x, a, b, eps=1e-6):
    mean = jnp.mean(x, axis=-1, keepdims=True)
    d = x - mean
    std = jnp.sqrt(jnp.sum(d * d, axis=-1, keepdims=True) / (x.shape[-1] - 1))
    return a * d / (std + eps) + b


def encoder_ref(x, mask, params, h):
    B, S, D = x.shape
    dk = D // h
    for p in params["layers"]:
        xn = _ln_ref(x, p["ln1_a"], p["ln1_b"])
        q = (xn @ p["wq"] + p["bq"]).reshape(B, S, h, dk).transpose(0, 2, 1, 3)
        k = (xn @ p["wk"] + p["bk"]).reshape(B, S, h, dk).transpose(0, 2, 1, 3)
        v = (xn @ p["wv"] + p["bv"]).reshape(B, S, h, dk).transpose(0, 2, 1, 3)
        scores = jnp.einsum("bhqd,bhkd->bhqk", q, k) / math.sqrt(dk)
        scores = jnp.where(mask.reshape(B, 1, 1, S) == 0, -1e9, scores)
        pattn = jax.nn.softmax(scores, axis=-1)
        a = jnp.einsum("bhqk,bhkd->bhqd", pattn, v).transpose(0, 2, 1, 3).reshape(B, S, D)
        x = x + (a @ p["wo"] + p["bo"])
        xn = _ln_ref(x, p["ln2_a"], p["ln2_b"])
        x = x + (jnp.maximum(xn @ p["w1"] + p["b1"], 0.0) @ p["w2"] + p["b2"])
    return _ln_ref(x, params["norm_a"], params["norm_b"])


# ----------------------------------- main ------------------------------------

if __name__ == "__main__":
    B, S, D, h, d_ff, N = 2, 8, 32, 4, 64, 2

    key = jax.random.PRNGKey(0)

    def nrm(key, shape):
        return 0.02 * jax.random.normal(key, shape, dtype=jnp.float32)

    layers = []
    for li in range(N):
        key, *ks = jax.random.split(key, 13)
        layers.append(
            dict(
                wq=nrm(ks[0], (D, D)), bq=nrm(ks[1], (D,)),
                wk=nrm(ks[2], (D, D)), bk=nrm(ks[3], (D,)),
                wv=nrm(ks[4], (D, D)), bv=nrm(ks[5], (D,)),
                wo=nrm(ks[6], (D, D)), bo=nrm(ks[7], (D,)),
                w1=nrm(ks[8], (D, d_ff)), b1=nrm(ks[9], (d_ff,)),
                w2=nrm(ks[10], (d_ff, D)), b2=nrm(ks[11], (D,)),
                ln1_a=jnp.ones((D,), jnp.float32), ln1_b=jnp.zeros((D,), jnp.float32),
                ln2_a=jnp.ones((D,), jnp.float32), ln2_b=jnp.zeros((D,), jnp.float32),
            )
        )
    params = dict(
        layers=layers,
        norm_a=jnp.ones((D,), jnp.float32),
        norm_b=jnp.zeros((D,), jnp.float32),
    )

    key, kx = jax.random.split(key)
    x = jax.random.normal(kx, (B, S, D), dtype=jnp.float32)
    # src mask (B, 1, S): mask out the last 2 positions of batch element 1
    mask = jnp.ones((B, 1, S), dtype=jnp.float32).at[1, 0, -2:].set(0.0)

    out = encoder_forward(x, mask, params, h)
    out = jax.block_until_ready(out)

    ref = encoder_ref(x, mask, params, h)
    assert out.shape == (B, S, D)
    assert jnp.allclose(out, ref, rtol=1e-3, atol=1e-3), float(jnp.max(jnp.abs(out - ref)))

    print("KERNEL_OK")
</pallas_src>

<mosaic_0001>
module attributes {stable_mosaic.version = 11 : i64} {
  func.func @_attn_sublayer_kernel(%arg0: i32, %arg1: memref<1x8x32xf32, #tpu.memory_space<vmem>>, %arg2: memref<1x1x8xf32, #tpu.memory_space<vmem>>, %arg3: memref<1x32xf32, #tpu.memory_space<vmem>>, %arg4: memref<1x32xf32, #tpu.memory_space<vmem>>, %arg5: memref<32x96xf32, #tpu.memory_space<vmem>>, %arg6: memref<1x96xf32, #tpu.memory_space<vmem>>, %arg7: memref<32x32xf32, #tpu.memory_space<vmem>>, %arg8: memref<1x32xf32, #tpu.memory_space<vmem>>, %arg9: memref<1x8x32xf32, #tpu.memory_space<vmem>>) attributes {dimension_semantics = [#tpu.dimension_semantics<parallel>], iteration_bounds = array<i64: 2>, scalar_prefetch = 0 : i64, scratch_operands = 0 : i64, tpu.core_type = #tpu.core_type<tc>, window_params = [{transform_indices = @transform_0, window_bounds = array<i64: 1, 8, 32>}, {transform_indices = @transform_1, window_bounds = array<i64: 1, 1, 8>}, {pipeline_mode = #tpu.pipeline_mode<synchronous>, transform_indices = @transform_2, window_bounds = array<i64: 1, 32>}, {pipeline_mode = #tpu.pipeline_mode<synchronous>, transform_indices = @transform_3, window_bounds = array<i64: 1, 32>}, {pipeline_mode = #tpu.pipeline_mode<synchronous>, transform_indices = @transform_4, window_bounds = array<i64: 32, 96>}, {pipeline_mode = #tpu.pipeline_mode<synchronous>, transform_indices = @transform_5, window_bounds = array<i64: 1, 96>}, {pipeline_mode = #tpu.pipeline_mode<synchronous>, transform_indices = @transform_6, window_bounds = array<i64: 32, 32>}, {pipeline_mode = #tpu.pipeline_mode<synchronous>, transform_indices = @transform_7, window_bounds = array<i64: 1, 32>}, {transform_indices = @transform_8, window_bounds = array<i64: 1, 8, 32>}]} {
    %c0 = arith.constant 0 : index
    %c0_0 = arith.constant 0 : index
    %c0_1 = arith.constant 0 : index
    %0 = vector.load %arg1[%c0, %c0_0, %c0_1] : memref<1x8x32xf32, #tpu.memory_space<vmem>>, vector<1x8x32xf32>
    %1 = vector.shape_cast %0 : vector<1x8x32xf32> to vector<8x32xf32>
    %c0_2 = arith.constant 0 : index
    %c0_3 = arith.constant 0 : index
    %2 = vector.load %arg3[%c0_2, %c0_3] : memref<1x32xf32, #tpu.memory_space<vmem>>, vector<1x32xf32>
    %c0_4 = arith.constant 0 : index
    %c0_5 = arith.constant 0 : index
    %3 = vector.load %arg4[%c0_4, %c0_5] : memref<1x32xf32, #tpu.memory_space<vmem>>, vector<1x32xf32>
    %cst = arith.constant dense<0.000000e+00> : vector<8xf32>
    %4 = vector.multi_reduction <add>, %1, %cst [1] : vector<8x32xf32> to vector<8xf32>
    %5 = vector.shape_cast %4 : vector<8xf32> to vector<8x1xf32>
    %cst_6 = arith.constant 3.200000e+01 : f32
    %6 = vector.broadcast %cst_6 : f32 to vector<8x1xf32>
    %7 = arith.divf %5, %6 : vector<8x1xf32>
    %8 = vector.broadcast %7 : vector<8x1xf32> to vector<8x32xf32>
    %9 = arith.subf %1, %8 : vector<8x32xf32>
    %10 = arith.mulf %9, %9 : vector<8x32xf32>
    %cst_7 = arith.constant dense<0.000000e+00> : vector<8xf32>
    %11 = vector.multi_reduction <add>, %10, %cst_7 [1] : vector<8x32xf32> to vector<8xf32>
    %12 = vector.shape_cast %11 : vector<8xf32> to vector<8x1xf32>
    %cst_8 = arith.constant 0.0322580636 : f32
    %13 = vector.broadcast %cst_8 : f32 to vector<8x1xf32>
    %14 = arith.mulf %12, %13 : vector<8x1xf32>
    %15 = math.sqrt %14 : vector<8x1xf32>
    %16 = vector.broadcast %2 : vector<1x32xf32> to vector<8x32xf32>
    %17 = arith.mulf %16, %9 : vector<8x32xf32>
    %cst_9 = arith.constant 9.99999997E-7 : f32
    %18 = vector.broadcast %cst_9 : f32 to vector<8x1xf32>
    %19 = arith.addf %15, %18 : vector<8x1xf32>
    %20 = vector.broadcast %19 : vector<8x1xf32> to vector<8x32xf32>
    %21 = arith.divf %17, %20 : vector<8x32xf32>
    %22 = vector.broadcast %3 : vector<1x32xf32> to vector<8x32xf32>
    %23 = arith.addf %21, %22 : vector<8x32xf32>
    %c0_10 = arith.constant 0 : index
    %c0_11 = arith.constant 0 : index
    %24 = vector.load %arg5[%c0_10, %c0_11] : memref<32x96xf32, #tpu.memory_space<vmem>>, vector<32x96xf32>
    %cst_12 = arith.constant dense<0.000000e+00> : vector<8x96xf32>
    %25 = tpu.matmul %23, %24, %cst_12 {dimension_numbers = #tpu.dot_dimension_numbers<[1], [0], [0], [1], [0, 0, 1, 1], [], []>} : vector<8x32xf32>, vector<32x96xf32>, vector<8x96xf32> -> vector<8x96xf32>
    %c0_13 = arith.constant 0 : index
    %c0_14 = arith.constant 0 : index
    %26 = vector.load %arg6[%c0_13, %c0_14] : memref<1x96xf32, #tpu.memory_space<vmem>>, vector<1x96xf32>
    %27 = vector.broadcast %26 : vector<1x96xf32> to vector<8x96xf32>
    %28 = arith.addf %25, %27 : vector<8x96xf32>
    %c0_15 = arith.constant 0 : index
    %c0_16 = arith.constant 0 : index
    %c0_17 = arith.constant 0 : index
    %29 = vector.load %arg2[%c0_15, %c0_16, %c0_17] : memref<1x1x8xf32, #tpu.memory_space<vmem>>, vector<1x1x8xf32>
    %30 = vector.shape_cast %29 : vector<1x1x8xf32> to vector<1x8xf32>
    %31 = vector.extract_strided_slice %28 {offsets = [0, 0], sizes = [8, 8], strides = [1, 1]} : vector<8x96xf32> to vector<8x8xf32>
    %32 = vector.extract_strided_slice %28 {offsets = [0, 32], sizes = [8, 8], strides = [1, 1]} : vector<8x96xf32> to vector<8x8xf32>
    %33 = vector.extract_strided_slice %28 {offsets = [0, 64], sizes = [8, 8], strides = [1, 1]} : vector<8x96xf32> to vector<8x8xf32>
    %cst_18 = arith.constant dense<0.000000e+00> : vector<8x8xf32>
    %34 = tpu.matmul %31, %32, %cst_18 {dimension_numbers = #tpu.dot_dimension_numbers<[1], [1], [0], [0], [0, 0, 1, 0], [], []>} : vector<8x8xf32>, vector<8x8xf32>, vector<8x8xf32> -> vector<8x8xf32>
    %cst_19 = arith.constant 0.353553385 : f32
    %35 = vector.broadcast %cst_19 : f32 to vector<8x8xf32>
    %36 = arith.mulf %34, %35 : vector<8x8xf32>
    %cst_20 = arith.constant 0.000000e+00 : f32
    %37 = vector.broadcast %cst_20 : f32 to vector<1x8xf32>
    %38 = arith.cmpf oeq, %30, %37 : vector<1x8xf32>
    %cst_21 = arith.constant -1.000000e+09 : f32
    %39 = vector.shape_cast %38 : vector<1x8xi1> to vector<1x8xi1>
    %40 = vector.broadcast %39 : vector<1x8xi1> to vector<8x8xi1>
    %41 = vector.broadcast %cst_21 : f32 to vector<8x8xf32>
    %42 = arith.select %40, %41, %36 : vector<8x8xi1>, vector<8x8xf32>
    %cst_22 = arith.constant dense<0xFF800000> : vector<8xf32>
    %43 = vector.multi_reduction <maximumf>, %42, %cst_22 [1] : vector<8x8xf32> to vector<8xf32>
    %44 = vector.shape_cast %43 : vector<8xf32> to vector<8x1xf32>
    %45 = vector.broadcast %44 : vector<8x1xf32> to vector<8x8xf32>
    %46 = arith.subf %42, %45 : vector<8x8xf32>
    %47 = math.exp %46 : vector<8x8xf32>
    %cst_23 = arith.constant dense<0.000000e+00> : vector<8xf32>
    %48 = vector.multi_reduction <add>, %47, %cst_23 [1] : vector<8x8xf32> to vector<8xf32>
    %49 = vector.shape_cast %48 : vector<8xf32> to vector<8x1xf32>
    %50 = tpu.reciprocal %49 {approx = true} : vector<8x1xf32> -> vector<8x1xf32>
    %51 = vector.broadcast %50 : vector<8x1xf32> to vector<8x8xf32>
    %52 = arith.mulf %47, %51 : vector<8x8xf32>
    %cst_24 = arith.constant dense<0.000000e+00> : vector<8x8xf32>
    %53 = tpu.matmul %52, %33, %cst_24 {dimension_numbers = #tpu.dot_dimension_numbers<[1], [0], [0], [1], [0, 0, 1, 1], [], []>} : vector<8x8xf32>, vector<8x8xf32>, vector<8x8xf32> -> vector<8x8xf32>
    %54 = vector.extract_strided_slice %28 {offsets = [0, 8], sizes = [8, 8], strides = [1, 1]} : vector<8x96xf32> to vector<8x8xf32>
    %55 = vector.extract_strided_slice %28 {offsets = [0, 40], sizes = [8, 8], strides = [1, 1]} : vector<8x96xf32> to vector<8x8xf32>
    %56 = vector.extract_strided_slice %28 {offsets = [0, 72], sizes = [8, 8], strides = [1, 1]} : vector<8x96xf32> to vector<8x8xf32>
    %cst_25 = arith.constant dense<0.000000e+00> : vector<8x8xf32>
    %57 = tpu.matmul %54, %55, %cst_25 {dimension_numbers = #tpu.dot_dimension_numbers<[1], [1], [0], [0], [0, 0, 1, 0], [], []>} : vector<8x8xf32>, vector<8x8xf32>, vector<8x8xf32> -> vector<8x8xf32>
    %cst_26 = arith.constant 0.353553385 : f32
    %58 = vector.broadcast %cst_26 : f32 to vector<8x8xf32>
    %59 = arith.mulf %57, %58 : vector<8x8xf32>
    %cst_27 = arith.constant 0.000000e+00 : f32
    %60 = vector.broadcast %cst_27 : f32 to vector<1x8xf32>
    %61 = arith.cmpf oeq, %30, %60 : vector<1x8xf32>
    %cst_28 = arith.constant -1.000000e+09 : f32
    %62 = vector.shape_cast %61 : vector<1x8xi1> to vector<1x8xi1>
    %63 = vector.broadcast %62 : vector<1x8xi1> to vector<8x8xi1>
    %64 = vector.broadcast %cst_28 : f32 to vector<8x8xf32>
    %65 = arith.select %63, %64, %59 : vector<8x8xi1>, vector<8x8xf32>
    %cst_29 = arith.constant dense<0xFF800000> : vector<8xf32>
    %66 = vector.multi_reduction <maximumf>, %65, %cst_29 [1] : vector<8x8xf32> to vector<8xf32>
    %67 = vector.shape_cast %66 : vector<8xf32> to vector<8x1xf32>
    %68 = vector.broadcast %67 : vector<8x1xf32> to vector<8x8xf32>
    %69 = arith.subf %65, %68 : vector<8x8xf32>
    %70 = math.exp %69 : vector<8x8xf32>
    %cst_30 = arith.constant dense<0.000000e+00> : vector<8xf32>
    %71 = vector.multi_reduction <add>, %70, %cst_30 [1] : vector<8x8xf32> to vector<8xf32>
    %72 = vector.shape_cast %71 : vector<8xf32> to vector<8x1xf32>
    %73 = tpu.reciprocal %72 {approx = true} : vector<8x1xf32> -> vector<8x1xf32>
    %74 = vector.broadcast %73 : vector<8x1xf32> to vector<8x8xf32>
    %75 = arith.mulf %70, %74 : vector<8x8xf32>
    %cst_31 = arith.constant dense<0.000000e+00> : vector<8x8xf32>
    %76 = tpu.matmul %75, %56, %cst_31 {dimension_numbers = #tpu.dot_dimension_numbers<[1], [0], [0], [1], [0, 0, 1, 1], [], []>} : vector<8x8xf32>, vector<8x8xf32>, vector<8x8xf32> -> vector<8x8xf32>
    %77 = vector.extract_strided_slice %28 {offsets = [0, 16], sizes = [8, 8], strides = [1, 1]} : vector<8x96xf32> to vector<8x8xf32>
    %78 = vector.extract_strided_slice %28 {offsets = [0, 48], sizes = [8, 8], strides = [1, 1]} : vector<8x96xf32> to vector<8x8xf32>
    %79 = vector.extract_strided_slice %28 {offsets = [0, 80], sizes = [8, 8], strides = [1, 1]} : vector<8x96xf32> to vector<8x8xf32>
    %cst_32 = arith.constant dense<0.000000e+00> : vector<8x8xf32>
    %80 = tpu.matmul %77, %78, %cst_32 {dimension_numbers = #tpu.dot_dimension_numbers<[1], [1], [0], [0], [0, 0, 1, 0], [], []>} : vector<8x8xf32>, vector<8x8xf32>, vector<8x8xf32> -> vector<8x8xf32>
    %cst_33 = arith.constant 0.353553385 : f32
    %81 = vector.broadcast %cst_33 : f32 to vector<8x8xf32>
    %82 = arith.mulf %80, %81 : vector<8x8xf32>
    %cst_34 = arith.constant 0.000000e+00 : f32
    %83 = vector.broadcast %cst_34 : f32 to vector<1x8xf32>
    %84 = arith.cmpf oeq, %30, %83 : vector<1x8xf32>
    %cst_35 = arith.constant -1.000000e+09 : f32
    %85 = vector.shape_cast %84 : vector<1x8xi1> to vector<1x8xi1>
    %86 = vector.broadcast %85 : vector<1x8xi1> to vector<8x8xi1>
    %87 = vector.broadcast %cst_35 : f32 to vector<8x8xf32>
    %88 = arith.select %86, %87, %82 : vector<8x8xi1>, vector<8x8xf32>
    %cst_36 = arith.constant dense<0xFF800000> : vector<8xf32>
    %89 = vector.multi_reduction <maximumf>, %88, %cst_36 [1] : vector<8x8xf32> to vector<8xf32>
    %90 = vector.shape_cast %89 : vector<8xf32> to vector<8x1xf32>
    %91 = vector.broadcast %90 : vector<8x1xf32> to vector<8x8xf32>
    %92 = arith.subf %88, %91 : vector<8x8xf32>
    %93 = math.exp %92 : vector<8x8xf32>
    %cst_37 = arith.constant dense<0.000000e+00> : vector<8xf32>
    %94 = vector.multi_reduction <add>, %93, %cst_37 [1] : vector<8x8xf32> to vector<8xf32>
    %95 = vector.shape_cast %94 : vector<8xf32> to vector<8x1xf32>
    %96 = tpu.reciprocal %95 {approx = true} : vector<8x1xf32> -> vector<8x1xf32>
    %97 = vector.broadcast %96 : vector<8x1xf32> to vector<8x8xf32>
    %98 = arith.mulf %93, %97 : vector<8x8xf32>
    %cst_38 = arith.constant dense<0.000000e+00> : vector<8x8xf32>
    %99 = tpu.matmul %98, %79, %cst_38 {dimension_numbers = #tpu.dot_dimension_numbers<[1], [0], [0], [1], [0, 0, 1, 1], [], []>} : vector<8x8xf32>, vector<8x8xf32>, vector<8x8xf32> -> vector<8x8xf32>
    %100 = vector.extract_strided_slice %28 {offsets = [0, 24], sizes = [8, 8], strides = [1, 1]} : vector<8x96xf32> to vector<8x8xf32>
    %101 = vector.extract_strided_slice %28 {offsets = [0, 56], sizes = [8, 8], strides = [1, 1]} : vector<8x96xf32> to vector<8x8xf32>
    %102 = vector.extract_strided_slice %28 {offsets = [0, 88], sizes = [8, 8], strides = [1, 1]} : vector<8x96xf32> to vector<8x8xf32>
    %cst_39 = arith.constant dense<0.000000e+00> : vector<8x8xf32>
    %103 = tpu.matmul %100, %101, %cst_39 {dimension_numbers = #tpu.dot_dimension_numbers<[1], [1], [0], [0], [0, 0, 1, 0], [], []>} : vector<8x8xf32>, vector<8x8xf32>, vector<8x8xf32> -> vector<8x8xf32>
    %cst_40 = arith.constant 0.353553385 : f32
    %104 = vector.broadcast %cst_40 : f32 to vector<8x8xf32>
    %105 = arith.mulf %103, %104 : vector<8x8xf32>
    %cst_41 = arith.constant 0.000000e+00 : f32
    %106 = vector.broadcast %cst_41 : f32 to vector<1x8xf32>
    %107 = arith.cmpf oeq, %30, %106 : vector<1x8xf32>
    %cst_42 = arith.constant -1.000000e+09 : f32
    %108 = vector.shape_cast %107 : vector<1x8xi1> to vector<1x8xi1>
    %109 = vector.broadcast %108 : vector<1x8xi1> to vector<8x8xi1>
    %110 = vector.broadcast %cst_42 : f32 to vector<8x8xf32>
    %111 = arith.select %109, %110, %105 : vector<8x8xi1>, vector<8x8xf32>
    %cst_43 = arith.constant dense<0xFF800000> : vector<8xf32>
    %112 = vector.multi_reduction <maximumf>, %111, %cst_43 [1] : vector<8x8xf32> to vector<8xf32>
    %113 = vector.shape_cast %112 : vector<8xf32> to vector<8x1xf32>
    %114 = vector.broadcast %113 : vector<8x1xf32> to vector<8x8xf32>
    %115 = arith.subf %111, %114 : vector<8x8xf32>
    %116 = math.exp %115 : vector<8x8xf32>
    %cst_44 = arith.constant dense<0.000000e+00> : vector<8xf32>
    %117 = vector.multi_reduction <add>, %116, %cst_44 [1] : vector<8x8xf32> to vector<8xf32>
    %118 = vector.shape_cast %117 : vector<8xf32> to vector<8x1xf32>
    %119 = tpu.reciprocal %118 {approx = true} : vector<8x1xf32> -> vector<8x1xf32>
    %120 = vector.broadcast %119 : vector<8x1xf32> to vector<8x8xf32>
    %121 = arith.mulf %116, %120 : vector<8x8xf32>
    %cst_45 = arith.constant dense<0.000000e+00> : vector<8x8xf32>
    %122 = tpu.matmul %121, %102, %cst_45 {dimension_numbers = #tpu.dot_dimension_numbers<[1], [0], [0], [1], [0, 0, 1, 1], [], []>} : vector<8x8xf32>, vector<8x8xf32>, vector<8x8xf32> -> vector<8x8xf32>
    %123 = tpu.concatenate %53, %76, %99, %122 in 1 : vector<8x8xf32>, vector<8x8xf32>, vector<8x8xf32>, vector<8x8xf32> -> vector<8x32xf32>
    %c0_46 = arith.constant 0 : index
    %c0_47 = arith.constant 0 : index
    %124 = vector.load %arg7[%c0_46, %c0_47] : memref<32x32xf32, #tpu.memory_space<vmem>>, vector<32x32xf32>
    %cst_48 = arith.constant dense<0.000000e+00> : vector<8x32xf32>
    %125 = tpu.matmul %123, %124, %cst_48 {dimension_numbers = #tpu.dot_dimension_numbers<[1], [0], [0], [1], [0, 0, 1, 1], [], []>} : vector<8x32xf32>, vector<32x32xf32>, vector<8x32xf32> -> vector<8x32xf32>
    %c0_49 = arith.constant 0 : index
    %c0_50 = arith.constant 0 : index
    %126 = vector.load %arg8[%c0_49, %c0_50] : memref<1x32xf32, #tpu.memory_space<vmem>>, vector<1x32xf32>
    %127 = vector.broadcast %126 : vector<1x32xf32> to vector<8x32xf32>
    %128 = arith.addf %125, %127 : vector<8x32xf32>
    %129 = arith.addf %1, %128 : vector<8x32xf32>
    %c0_51 = arith.constant 0 : index
    %c0_52 = arith.constant 0 : index
    %c0_53 = arith.constant 0 : index
    %130 = vector.load %arg9[%c0_51, %c0_52, %c0_53] : memref<1x8x32xf32, #tpu.memory_space<vmem>>, vector<1x8x32xf32>
    %131 = vector.shape_cast %130 : vector<1x8x32xf32> to vector<8x32xf32>
    %132 = vector.shape_cast %129 : vector<8x32xf32> to vector<1x8x32xf32>
    tpu.vector_store %arg9[%c0_51, %c0_52, %c0_53], %132 {strides = array<i32>} : memref<1x8x32xf32, #tpu.memory_space<vmem>>, vector<1x8x32xf32>,
    return
  }
  func.func @transform_0(%arg0: i32) -> (i32, i32, i32) {
    %c0_i32 = arith.constant 0 : i32
    %c0_i32_0 = arith.constant 0 : i32
    %c0_i32_1 = arith.constant 0 : i32
    return %arg0, %c0_i32, %c0_i32_0 : i32, i32, i32
  }
  func.func @transform_1(%arg0: i32) -> (i32, i32, i32) {
    %c0_i32 = arith.constant 0 : i32
    %c0_i32_0 = arith.constant 0 : i32
    %c0_i32_1 = arith.constant 0 : i32
    return %arg0, %c0_i32, %c0_i32_0 : i32, i32, i32
  }
  func.func @transform_2(%arg0: i32) -> (i32, i32) {
    %c0_i32 = arith.constant 0 : i32
    %c0_i32_0 = arith.constant 0 : i32
    %c0_i32_1 = arith.constant 0 : i32
    return %c0_i32, %c0_i32_0 : i32, i32
  }
  func.func @transform_3(%arg0: i32) -> (i32, i32) {
    %c0_i32 = arith.constant 0 : i32
    %c0_i32_0 = arith.constant 0 : i32
    %c0_i32_1 = arith.constant 0 : i32
    return %c0_i32, %c0_i32_0 : i32, i32
  }
  func.func @transform_4(%arg0: i32) -> (i32, i32) {
    %c0_i32 = arith.constant 0 : i32
    %c0_i32_0 = arith.constant 0 : i32
    %c0_i32_1 = arith.constant 0 : i32
    return %c0_i32, %c0_i32_0 : i32, i32
  }
  func.func @transform_5(%arg0: i32) -> (i32, i32) {
    %c0_i32 = arith.constant 0 : i32
    %c0_i32_0 = arith.constant 0 : i32
    %c0_i32_1 = arith.constant 0 : i32
    return %c0_i32, %c0_i32_0 : i32, i32
  }
  func.func @transform_6(%arg0: i32) -> (i32, i32) {
    %c0_i32 = arith.constant 0 : i32
    %c0_i32_0 = arith.constant 0 : i32
    %c0_i32_1 = arith.constant 0 : i32
    return %c0_i32, %c0_i32_0 : i32, i32
  }
  func.func @transform_7(%arg0: i32) -> (i32, i32) {
    %c0_i32 = arith.constant 0 : i32
    %c0_i32_0 = arith.constant 0 : i32
    %c0_i32_1 = arith.constant 0 : i32
    return %c0_i32, %c0_i32_0 : i32, i32
  }
  func.func @transform_8(%arg0: i32) -> (i32, i32, i32) {
    %c0_i32 = arith.constant 0 : i32
    %c0_i32_0 = arith.constant 0 : i32
    %c0_i32_1 = arith.constant 0 : i32
    return %arg0, %c0_i32, %c0_i32_0 : i32, i32, i32
  }
}

</mosaic_0001>

<bundles_post_ra>
// kernel: tpu_custom_call.1
= control target key start
LH: loop header
LB: loop body
LE: loop exit
PB: predicated region body
PF: predicated region fallthrough
CT: control target
= control target key end

     0   :  { %s1591_s0 = inlined_call_operand.hbm [shape: f32[2,8,32], index: 0, kind: input, shape index: {}]   ;;  %s1592_s1 = inlined_call_operand.hbm [shape: f32[2,1,8], index: 1, kind: input, shape index: {}]   ;;  %s1593_s2 = inlined_call_operand.vmem [shape: f32[1,32], index: 2, kind: input, shape index: {}]   ;;  %s1594_s3 = inlined_call_operand.vmem [shape: f32[1,32], index: 3, kind: input, shape index: {}]   ;;  %s1595_s4 = inlined_call_operand.hbm [shape: f32[32,96], index: 4, kind: input, shape index: {}]   ;;  %s1596_s5 = inlined_call_operand.vmem [shape: f32[1,96], index: 5, kind: input, shape index: {}]   ;;  %s1597_s6 = inlined_call_operand.hbm [shape: f32[32,32], index: 6, kind: input, shape index: {}]   ;;  %s1598_s7 = inlined_call_operand.vmem [shape: f32[1,32], index: 7, kind: input, shape index: {}]   ;;  %s1599_s8 = inlined_call_operand.hbm [shape: f32[2,8,32], index: 8, kind: output, shape index: {}]  }
   0x1   :  { %1604 = sst [smem:[#allocation20_spill]] %s1595_s4 }
   0x2   :  { %1605 = sst [smem:[#allocation21_spill]] %s1597_s6 }
   0x3   :  { %13 = vsyncpa [#allocation3], 0 }
   0x4   :  { %15 = vsyncpa [#allocation3 + $0x1], 0 }
   0x5   :  { %16 = vsyncpa [#allocation6], 0 }
   0x6   :  { %18 = vsyncpa [#allocation6 + $0x1], 0 }
   0x7   :  { %19 = vsyncpa [#allocation9], 0 }
   0x8   :  { %20 = vsyncpa [#allocation4], 0 }
   0x9   :  { %22 = vsyncpa [#allocation4 + $0x1], 0  ;;  %s1337_s27 = smov 0   ;;  %s1339_s28 = smov 0  }
   0xa   :  { %s1341_s29 = smov 0   ;;  %s1343_s30 = smov 0  }
   0xb LB: > { %1606 = sst [smem:[#allocation16_spill]] %s1266_s29  ;;  %s1361_s12 = sadd.s32 4294967295, %s1270_s30   ;;  %s1270_s30 = sphi %s1343_s30, %s1622_s30   ;;  %s1266_s29 = sphi %s1341_s29, %s1624_s29   ;;  %s1262_s28 = sphi %s1339_s28, %s1626_s28   ;;  %s1258_s27 = sphi %s1337_s27, %s1625_s27  }
   0xc   : > { %s1607_s4 = sld [smem:[#allocation20_spill]]  ;;  %p927_p0 = scmp.ge.s32.totalorder %s1270_s30, 1 }
   0xd   : > { %p49_p1 = scmp.eq.s32.totalorder %s1361_s12, 0  ;;  %p237_p2 = scmp.lt.s32.totalorder %s1270_s30, 3 }
   0xe   : > { %s1272_s14 = smov [#allocation7]   ;;  %s1609_s6 = sld [smem:[#allocation21_spill]] }
   0xf   : > { %p1366_p3 = pnand %p927_p0, %p237_p2  ;;  %s256_s15 = sshll.u32 %s1272_s14, 4  ;;  %s257_s15 = int_to_ptr.vmem [resolvable:$true] %s256_s15 }
  0x10   : > { %s1273_s19 = smov [#allocation8]   ;;  %s1274_s21 = smov 128  }
  0x11   : > { %p970_p4 = pneg %p1366_p3  ;;  %s273_s20 = sshll.u32 %s1273_s19, 4  ;;  %s274_s20 = int_to_ptr.vmem [resolvable:$true] %s273_s20 }
  0x12   : > { %s254_s11 = sshll.u32 %s1607_s4, 4  ;;  %s1275_s22 = smov 8   ;;  %s255_s11 = int_to_ptr.hbm [resolvable:$true] %s254_s11 }
  0x13   : > { %p971_p6 = pnand %p970_p4, %p49_p1  ;;  %s926_s23 = sadd.s32 4294967294, %s1270_s30  }
  0x14   : > { %s271_s18 = sshll.u32 %s1609_s6, 4  ;;  %s1380_s24 = sadd.s32 1, %s1270_s30   ;;  %s272_s18 = int_to_ptr.hbm [resolvable:$true] %s271_s18 }
  0x15   : > { %973 = dma.hbm_to_vmem [thread:$0]  (!%p971_p6), %s255_s11, 512, %s257_s15, [#allocation6], %s1274_s21, %s1274_s21, %s1275_s22  }
  0x16   : > { %976 = dma.hbm_to_vmem [thread:$0]  (!%p971_p6), %s272_s18, 512, %s274_s20, [#allocation9], %s1274_s21, %s1274_s21, %s1275_s22  }
  0x17   : > { %1610 = sst [smem:[#allocation17_spill]] %s1380_s24  ;;  %s32_s25 = ssub.s32 %s1270_s30, %s1380_s24 }
  0x18   : > { %s35_s26 = sadd.s32 1, %s1266_s29  ;;  %p33_p7 = scmp.eq.s32.totalorder %s32_s25, 0 }
  0x19   : > { %p42_p8 = scmp.ne.s32.totalorder %s1266_s29, %s1262_s28  ;;  %p43_p9 = scmp.eq.s32.totalorder %s1270_s30, 0 }
  0x1a   : > { %p48_p10 = scmp.ne.s32.totalorder %s1262_s28, %s1258_s27  ;;  %p224_p13 = scmp.eq.s32.totalorder %s1361_s12, 1 }
  0x1b   : > { %s1391_s9 = scalar_select %p33_p7, %s1266_s29, %s35_s26  }
  0x1c   : > { %p1393_p11 = por %p43_p9, %p42_p8  ;;  %p1399_p12 = por %p49_p1, %p48_p10 }
  0x1d   : > { %1611 = sst [smem:[#allocation18_spill]] %s1391_s9  ;;  %p230_p0 = scmp.eq.s32.totalorder %s926_s23, 1 }
  0x1e   : > { %p990_p2 = scmp.lt.s32.totalorder %s1270_s30, 2  ;;  %s1406_s14 = sand.u32 1, %s1266_s29  }
  0x1f   : > { %p1408_p4 = por %p224_p13, %p42_p8  ;;  %p1412_p6 = por %p230_p0, %p48_p10 }
  0x20   : > { %s931_s17 = sshll.u32 %s1406_s14, 3  ;;  %s932_s18 = sshll.u32 %s1270_s30, 3 }
  0x21   : > { %s1615_s16 = scalar_select %p1412_p6, 1, 0 }
  0x22   : > { %s298_s21 = scalar_lea.hbm %s1591_s0, %s932_s18  ;;  %s294_s22 = scalar_lea.vmem [#allocation2], %s931_s17 }
  0x23   : > { %1616 = sst [smem:[#allocation19_spill]] %s1615_s16  ;;  %s302_s23 = sshll.u32 %s294_s22, 4  ;;  %s303_s23 = int_to_ptr.vmem [resolvable:$true] %s302_s23 }
  0x24   : > { %s300_s25 = sshll.u32 %s298_s21, 4  ;;  %p1423_p7 = pnand %p990_p2, %p1393_p11  ;;  %s301_s25 = int_to_ptr.hbm [resolvable:$true] %s300_s25 }
  0x25   : > { %s309_s4 = sand.u32 1, %s1270_s30   ;;  %s291_s6 = scalar_lea.sflag [#allocation3], %s1406_s14 }
  0x26   : > { %s1132_s9 = sshra.s32 %s301_s25, 4  ;;  %p1136_p9 = pneg %p1423_p7  ;;  %s1133_s9 = int_to_ptr.hbm [resolvable:$true] %s1132_s9 }
  0x27   : > { %s1134_s29 = scalar_lea.hbm %s1133_s9, 8  ;;  %s1139_s18 = scalar_lea.hbm %s1591_s0, 16 }
  0x28   : > { %p1135_p8 = scmp.ne.s32.totalorder %s1133_s9, %s1134_s29  ;;  %p1140_p11 = scmp.lt.s32.totalorder %s1133_s9, %s1591_s0 }
  0x29   : > { %p1141_p0 = scmp.lt.s32.totalorder %s1139_s18, %s1134_s29 }
  0x2a   : > { %p1137_p10 = pnand %p1136_p9, %p1135_p8 }
  0x2b   : > { %p1142_p2 = por %p1141_p0, %p1140_p11 }
  0x2c   : > { %p1138_p13 = pneg %p1137_p10 }
  0x2e   : > { %p1143_p5 = pnand %p1142_p2, %p1138_p13 }
  0x30   : > { %1146 = shalt.err (!%p1143_p5)
}
  0x31   : > { %980 = dma.hbm_to_vmem [thread:$0]  (!%p1423_p7), %s301_s25, 128, %s303_s23, %s291_s6  }
  0x32   : > { %s315_s24 = scalar_lea.hbm %s1592_s1, %s1270_s30  ;;  %s312_s17 = scalar_lea.vmem [#allocation5], %s1406_s14 }
  0x33   : > { %s319_s10 = sshll.u32 %s312_s17, 4  ;;  %s317_s16 = sshll.u32 %s315_s24, 4  ;;  %s320_s10 = int_to_ptr.vmem [resolvable:$true] %s319_s10  ;;  %s318_s16 = int_to_ptr.hbm [resolvable:$true] %s317_s16 }
  0x34   : > { %s310_s9 = scalar_lea.sflag [#allocation6], %s309_s4  ;;  %s1162_s29 = sshra.s32 %s318_s16, 4  ;;  %s1163_s29 = int_to_ptr.hbm [resolvable:$true] %s1162_s29 }
  0x35   : > { %s1164_s18 = scalar_lea.hbm %s1163_s29, 1  ;;  %s1169_s23 = scalar_lea.hbm %s1592_s1, 2 }
  0x36   : > { %p1165_p5 = scmp.ne.s32.totalorder %s1163_s29, %s1164_s18  ;;  %p1170_p13 = scmp.lt.s32.totalorder %s1163_s29, %s1592_s1 }
  0x37   : > { %p1171_p11 = scmp.lt.s32.totalorder %s1169_s23, %s1164_s18 }
  0x38   : > { %p1167_p8 = pnand %p1165_p5, %p1136_p9 }
  0x39   : > { %p1172_p0 = por %p1171_p11, %p1170_p13 }
  0x3a   : > { %p1168_p10 = pneg %p1167_p8 }
  0x3c   : > { %p1173_p2 = pnand %p1172_p0, %p1168_p10 }
  0x3e   : > { %1176 = shalt.err (!%p1173_p2)
}
  0x3f   : > { %983 = dma.hbm_to_vmem [thread:$0]  (!%p1423_p7), %s318_s16, 16, %s320_s10, %s310_s9  }
  0x40   : > { %328 = sbr.rel (%p1366_p3) target bundleno = 1407 (0x57f), region = 52  ;;  %s1461_s4 = sand.u32 (!%p1366_p3), 1, %s1262_s28  }
  0x41   : > { %s934_s24 = sshll.u32 (!%p1366_p3), %s1461_s4, 3  ;;  %s331_s14 = scalar_lea.sflag (!%p1366_p3), [#allocation3], %s1461_s4 }
  0x42   : > { %s334_s21 = scalar_lea.vmem (!%p1366_p3), [#allocation2], %s934_s24 }
  0x45   : > { %1237 = dma.done.wait (%p1399_p12), %s331_s14, 128  }
  0x46   : > { %1239 = vsyncadd (%p1399_p12), %s331_s14, 4294967168  ;;  %s340_s13 = sand.u32 1, %s1361_s12   ;;  %s343_s26 = scalar_lea.vmem [#allocation5], %s1461_s4 }
  0x47   : > { %s341_s16 = scalar_lea.sflag [#allocation6], %s340_s13 }
  0x48   : > { %1241 = dma.done.wait (%p1399_p12), %s341_s16, 16  }
  0x49   : > { %1243 = vsyncadd (%p1399_p12), %s341_s16, 4294967280 }
  0x4a   : > { %1245 = dma.done.wait (%p49_p1), [#allocation6], 512  }
  0x4b   : > { %1247 = vsyncadd (%p49_p1), [#allocation6], 4294966784 }
  0x4c   : > { %1249 = dma.done.wait (%p49_p1), [#allocation9], 512  }
  0x4d   : > { %1251 = vsyncadd (%p49_p1), [#allocation9], 4294966784  ;;  %vm394_vm0 = vcmask 261120   ;;  %v1485_v0 = vld [vmem:[%s334_s21] sm:$0xff]  ;;  %v1276_v2 = vmov 32.0   ;;  %v448_v17 = vld [vmem:[#allocation7] sm:$0xff] }
  0x4e   : > { %v395_v1 = vsel %vm394_vm0, %v1485_v0, 0.0  ;;  %1050 = vrcp.f32 %v1276_v2  ;;  %v451_v14 = vld [vmem:[#allocation7 + $0x18] sm:$0xff]  ;;  %v450_v15 = vld [vmem:[#allocation7 + $0x10] sm:$0xff]  ;;  %v449_v16 = vld [vmem:[#allocation7 + $0x8] sm:$0xff]  ;;  %s1277_s18 = smov 72   ;;  %s1278_s19 = smov 120  }
  0x4f   : > { %396 = vadd.xlane.f32.xlu0 %v395_v1  ;;  %471 = vmatpush.msra.mxu0 %v451_v14  ;;  %v1046_v35 = vld [vmem:[%s1593_s2] ss:$0 sm:$0xff]  ;;  %s1279_s6 = smov 96   ;;  %s1280_s23 = smov 80   ;;  %vm483_vm8 = vcmask 64512   ;;  %v1284_v57 = vmov 0  }
  0x50   : > { %v1047_v42 = vld [vmem:[%s1594_s3] ss:$0 sm:$0xff]  ;;  %s1281_s25 = smov 88   ;;  %s1282_s20 = smov 104   ;;  %vm765_vm11 = vcmask 130048   ;;  %vm767_vm12 = vcmask 195584  }
  0x51   : > { %472 = vmatpush.msra.mxu0 %v450_v15  ;;  %v1048_v46 = vld [vmem:[%s1596_s5] ss:$0 sm:$0xff]  ;;  %s1283_s14 = smov 112   ;;  %s1285_s21 = smov 64  }
  0x52   : > { %v479_v56 = vld [vmem:[%s343_s26] sm:$0x1]  ;;  %s1286_s13 = smov 40   ;;  %s1287_s16 = smov 56  }
  0x53   : > { %473 = vmatpush.msra.mxu0 %v449_v16  ;;  %vm509_vm9 = vcmp.eq.f32.partialorder %v479_v56, 0.0  ;;  %s1288_s26 = smov 48   ;;  %s1289_s11 = smov 16   ;;  %v770_v56 = vld [vmem:[#allocation8 + $0x8] sm:$0xff] }
  0x54   : > { %v1051_v3 = vpop.eup %1050  ;;  %v510_v58 = vsel %vm509_vm9, 1, %v1284_v57  ;;  %s1290_s22 = smov 8   ;;  %s1291_s17 = smov 24   ;;  %v769_v57 = vld [vmem:[#allocation8] sm:$0xff] }
  0x55   : > { %v399_v4 = vmul.f32 32.0, %v1051_v3  ;;  %vm403_vm1 = vweird.f32 %v1051_v3  ;;  %474 = vmatpush.msra.mxu0 %v448_v17  ;;  %v511_v59 = vperm.slane %v510_v58, 0  ;;  %s953_s10 = sshll.u32 %s1361_s12, 3  ;;  %s803_s12 = scalar_lea.sflag [#allocation4], %s1461_s4 }
  0x57   : > { %v400_v5 = vsub.f32 1.0, %v399_v4  ;;  %vm1521_vm10 = vcmp.eq.s32.totalorder %v511_v59, 1 }
  0x59   : > { %v401_v6 = vmul.f32 %v1051_v3, %v400_v5 }
  0x5b   : > { %v402_v7 = vadd.f32 %v1051_v3, %v401_v6 }
  0x5d   : > { %v404_v8 = vsel %vm403_vm1, %v1051_v3, %v402_v7 }
  0xc2   : > { %v397_v9 = vpop.xlane.xlu0 %396 }
  0xc3   : > { %v405_v10 = vmul.f32 %v404_v8, %v397_v9 }
  0xc5   : > { %v406_v11 = vsub.f32 %v1485_v0, %v405_v10 }
  0xc7   : > { %v407_v12 = vmul.f32 %v406_v11, %v406_v11  ;;  %v427_v40 = vmul.f32 %v1046_v35, %v406_v11 }
  0xc9   : > { %v408_v13 = vsel %vm394_vm0, %v407_v12, 0.0 }
  0xca   : > { %409 = vadd.xlane.f32.xlu0 %v408_v13 }
 0x13d   : > { %v410_v18 = vpop.xlane.xlu0 %409 }
 0x13e   : > { %v411_v19 = vmul.f32 0.032258064, %v410_v18 }
 0x140   : > { %1052 = vrsqrt.f32 %v411_v19  ;;  %vm419_vm2 = vcmp.eq.f32.partialorder %v411_v19, inf  ;;  %v422_v27 = vand.u32 2147483648, %v411_v19  ;;  %vm421_vm3 = vcmp.eq.f32.partialorder %v411_v19, 0.0 }
 0x146   : > { %v1053_v20 = vpop.eup %1052 }
 0x147   : > { %v413_v21 = vmul.f32 %v1053_v20, %v411_v19 }
 0x149   : > { %v414_v22 = vmul.f32 %v1053_v20, %v413_v21 }
 0x14b   : > { %v415_v23 = vmul.f32 0.5, %v414_v22 }
 0x14d   : > { %v416_v24 = vsub.f32 1.5, %v415_v23 }
 0x14f   : > { %v417_v25 = vmul.f32 %v1053_v20, %v416_v24 }
 0x151   : > { %v418_v26 = vmul.f32 %v417_v25, %v411_v19 }
 0x153   : > { %v420_v28 = vsel %vm419_vm2, %v411_v19, %v418_v26 }
 0x154   : > { %v423_v29 = vsel %vm421_vm3, %v422_v27, %v420_v28 }
 0x155   : > { %v428_v30 = vadd.f32 1e-06, %v423_v29 }
 0x157   : > { %1054 = vrcp.f32 %v428_v30  ;;  %v440_v34 = vand.u32 2147483648, %v428_v30  ;;  %v438_v37 = vand.u32 2147483647, %v428_v30  ;;  %vm434_vm5 = vweird.f32 %v428_v30 }
 0x159   : > { %v441_v39 = vor.u32 1.1754944e-38, %v440_v34  ;;  %vm439_vm7 = vcmp.eq.f32.partialorder %v438_v37, 8.507059e+37 }
 0x15d   : > { %v1055_v31 = vpop.eup %1054 }
 0x15e   : > { %v430_v32 = vmul.f32 %v1055_v31, %v428_v30  ;;  %vm435_vm4 = vweird.f32 %v1055_v31 }
 0x15f   : > { %vm436_vm6 = vmor %vm434_vm5, %vm435_vm4 }
 0x160   : > { %v431_v33 = vsub.f32 1.0, %v430_v32 }
 0x162   : > { %v432_v36 = vmul.f32 %v1055_v31, %v431_v33 }
 0x164   : > { %v433_v38 = vadd.f32 %v1055_v31, %v432_v36 }
 0x166   : > { %v437_v41 = vsel %vm436_vm6, %v1055_v31, %v433_v38 }
 0x167   : > { %v442_v43 = vsel %vm439_vm7, %v441_v39, %v437_v41 }
 0x168   : > { %v443_v44 = vmul.f32 %v442_v43, %v427_v40 }
 0x16a   : > { %v447_v45 = vadd.f32 %v1047_v42, %v443_v44 }
 0x16c   : > { %938 = vmatmul.msk.f32.vlgmr.msra.gmra.mxu0 %vm394_vm0, %v447_v45 }
 0x1e9   : > { %v476_v47 = vpop.f32.mrf.mxu0 }
 0x1ea   : > { %v1501_v48 = vadd.f32 %v1048_v46, %v476_v47 }
 0x1ec   : > { %687 = vrot.lane.b32.xlu0 %v1501_v48, %s1277_s18  ;;  %551 = vrot.lane.b32.xlu2 %v1501_v48, %s1278_s19 }
 0x1ed   : > { %481 = vrot.lane.b32.xlu1 %v1501_v48, %s1279_s6  ;;  %s813_s6 = scalar_lea.hbm %s1599_s8, %s953_s10 }
 0x1f4   : > { %620 = vrot.lane.b32.xlu2 %v1501_v48, %s1280_s23  ;;  %s390_s23 = scalar_lea.vmem [#allocation10], %s934_s24  ;;  %s1212_s24 = scalar_lea.hbm %s1599_s8, 16 }
 0x1f5   : > { %553 = vrot.lane.b32.xlu1 %v1501_v48, %s1281_s25  ;;  %s815_s25 = sshll.u32 %s390_s23, 4  ;;  %s816_s25 = int_to_ptr.vmem [resolvable:$true] %s815_s25 }
 0x1fc   : > { %685 = vrot.lane.b32.xlu2 %v1501_v48, %s1282_s20  ;;  %s817_s20 = sshll.u32 %s813_s6, 4  ;;  %s818_s20 = int_to_ptr.hbm [resolvable:$true] %s817_s20 }
 0x1fd   : > { %618 = vrot.lane.b32.xlu1 %v1501_v48, %s1283_s14  ;;  %s1206_s14 = sshra.s32 %s818_s20, 4  ;;  %s1207_s14 = int_to_ptr.hbm [resolvable:$true] %s1206_s14 }
 0x1fe   : > { %p1213_p7 = scmp.lt.s32.totalorder %s1207_s14, %s1599_s8 }
 0x246   : > { %v552_v49 = vpop.permute.xlu2 %551 }
 0x24e   : > { %v621_v50 = vpop.permute.xlu2 %620 }
 0x256   : > { %v686_v53 = vpop.permute.xlu2 %685 }
 0x25e   : > { %v688_v51 = vpop.permute.xlu0 %687 }
 0x25f   : > { %v482_v52 = vpop.permute.xlu1 %481  ;;  %948 = vmatpush.xpose.msk.msrb.mxu0 %vm483_vm8, %v688_v51 }
 0x260   : > { %939 = vmatpush.xpose.msk.msra.mxu1 %vm483_vm8, %v482_v52 }
 0x262   : > { %949 = vmatmul.msk.f32.vlgmr.msrb.gmra.mxu0 %vm483_vm8, %v686_v53 }
 0x263   : > { %940 = vmatmul.msk.f32.vlgmr.msra.gmra.mxu1 %vm483_vm8, %v1501_v48 }
 0x264   : > { %945 = vmatpush.xpose.msk.msrb.mxu1 %vm483_vm8, %v621_v50 }
 0x267   : > { %v554_v54 = vpop.permute.xlu1 %553 }
 0x268   : > { %942 = vmatpush.xpose.msk.msra.mxu3 %vm483_vm8, %v554_v54  ;;  %v772_v54 = vld [vmem:[#allocation8 + $0x18] sm:$0xff] }
 0x269   : > { %792 = vmatpush.msra.mxu1 %v772_v54 }
 0x26b   : > { %943 = vmatmul.msk.f32.vlgmr.msra.gmra.mxu3 %vm483_vm8, %v552_v49 }
 0x26f   : > { %v619_v55 = vpop.permute.xlu1 %618 }
 0x270   : > { %946 = vmatmul.msk.f32.vlgmr.msrb.gmra.mxu1 %vm483_vm8, %v619_v55  ;;  %v771_v55 = vld [vmem:[#allocation8 + $0x10] sm:$0xff] }
 0x271   : > { %793 = vmatpush.msra.mxu1 %v771_v55 }
 0x273   : > { %794 = vmatpush.msra.mxu1 %v770_v56 }
 0x275   : > { %795 = vmatpush.msra.mxu1 %v769_v57 }
 0x2df   : > { %v710_v6 = vpop.f32.mrf.mxu0 }
 0x2e0   : > { %v505_v60 = vpop.f32.mrf.mxu1  ;;  %v713_v11 = vmul.f32 0.35355338, %v710_v6 }
 0x2e1   : > { %v508_v62 = vmul.f32 0.35355338, %v505_v60 }
 0x2e2   : > { %v714_v12 = vsel %vm1521_vm10, -1e+09, %v713_v11 }
 0x2e3   : > { %v513_v63 = vsel %vm1521_vm10, -1e+09, %v508_v62  ;;  %v715_v13 = vsel %vm483_vm8, %v714_v12, -inf }
 0x2e4   : > { %v514_v1 = vsel %vm483_vm8, %v513_v63, -inf }
 0x2e5   : > { %515 = vmax.xlane.f32.xlu1 %v514_v1  ;;  %v1049_v1 = vld [vmem:[%s1598_s7] ss:$0 sm:$0xff] }
 0x2ed   : > { %v643_v2 = vpop.f32.mrf.mxu1 }
 0x2ee   : > { %v646_v3 = vmul.f32 0.35355338, %v643_v2  ;;  %v576_v4 = vpop.f32.mrf.mxu3 }
 0x2ef   : > { %v579_v5 = vmul.f32 0.35355338, %v576_v4 }
 0x2f0   : > { %v647_v7 = vsel %vm1521_vm10, -1e+09, %v646_v3 }
 0x2f1   : > { %v648_v8 = vsel %vm483_vm8, %v647_v7, -inf  ;;  %v580_v9 = vsel %vm1521_vm10, -1e+09, %v579_v5 }
 0x2f2   : > { %649 = vmax.xlane.f32.xlu0 %v648_v8  ;;  %v581_v10 = vsel %vm483_vm8, %v580_v9, -inf }
 0x2f3   : > { %582 = vmax.xlane.f32.xlu2 %v581_v10 }
 0x2fb   : > { %716 = vmax.xlane.f32.xlu2 %v715_v13 }
 0x2fe   : > { %525 = vrot.lane.b32.xlu1 %v1501_v48, %s1285_s21  ;;  %s1208_s21 = scalar_lea.hbm %s1207_s14, 8 }
 0x2ff   : > { %p1209_p1 = scmp.ne.s32.totalorder %s1207_s14, %s1208_s21  ;;  %p1214_p9 = scmp.lt.s32.totalorder %s1212_s24, %s1208_s21 }
 0x301   : > { %p1210_p3 = pnand %p1209_p1, %p1408_p4  ;;  %p1215_p5 = por %p1214_p9, %p1213_p7 }
 0x303   : > { %p1211_p12 = pneg %p1210_p3 }
 0x305   : > { %p1216_p8 = pnand %p1215_p5, %p1211_p12 }
 0x358   : > { %v516_v14 = vpop.xlane.xlu1 %515 }
 0x359   : > { %v517_v15 = vsub.f32 %v513_v63, %v516_v14 }
 0x35b   : > { %v518_v16 = vmul.f32 1.442695, %v517_v15 }
 0x35d   : > { %1056 = vpow2.f32 %v518_v16 }
 0x363   : > { %v1057_v17 = vpop.eup %1056 }
 0x364   : > { %v520_v18 = vsel %vm483_vm8, %v1057_v17, 0.0 }
 0x365   : > { %v650_v19 = vpop.xlane.xlu0 %649  ;;  %521 = vadd.xlane.f32.xlu1 %v520_v18 }
 0x366   : > { %v651_v20 = vsub.f32 %v647_v7, %v650_v19  ;;  %v583_v21 = vpop.xlane.xlu2 %582 }
 0x367   : > { %v584_v27 = vsub.f32 %v580_v9, %v583_v21 }
 0x368   : > { %v652_v22 = vmul.f32 1.442695, %v651_v20 }
 0x369   : > { %v585_v30 = vmul.f32 1.442695, %v584_v27 }
 0x36a   : > { %1058 = vpow2.f32 %v652_v22 }
 0x36e   : > { %v717_v23 = vpop.xlane.xlu2 %716 }
 0x36f   : > { %v718_v24 = vsub.f32 %v714_v12, %v717_v23 }
 0x370   : > { %v1059_v25 = vpop.eup %1058  ;;  %v526_v26 = vpop.permute.xlu1 %525 }
 0x371   : > { %v719_v28 = vmul.f32 1.442695, %v718_v24  ;;  %546 = vmatpush.msra.mxu2 %v526_v26  ;;  %v654_v29 = vsel %vm483_vm8, %v1059_v25, 0.0 }
 0x372   : > { %655 = vadd.xlane.f32.xlu0 %v654_v29 }
 0x373   : > { %1060 = vpow2.f32 %v719_v28 }
 0x374   : > { %1062 = vpow2.f32 %v585_v30 }
 0x379   : > { %v1061_v31 = vpop.eup %1060 }
 0x37a   : > { %v721_v32 = vsel %vm483_vm8, %v1061_v31, 0.0  ;;  %v1063_v33 = vpop.eup %1062 }
 0x37b   : > { %722 = vadd.xlane.f32.xlu2 %v721_v32  ;;  %v587_v34 = vsel %vm483_vm8, %v1063_v33, 0.0 }
 0x37e   : > { %726 = vrot.lane.b32.xlu1 %v1501_v48, %s1286_s13 }
 0x383   : > { %588 = vadd.xlane.f32.xlu2 %v587_v34 }
 0x386   : > { %592 = vrot.lane.b32.xlu0 %v1501_v48, %s1287_s16 }
 0x39b   : > { %659 = vrot.lane.b32.xlu2 %v1501_v48, %s1288_s26 }
 0x3d8   : > { %v522_v35 = vpop.xlane.xlu1 %521 }
 0x3d9   : > { %1064 = vrcp.f32 %v522_v35 }
 0x3df   : > { %v1065_v36 = vpop.eup %1064 }
 0x3e0   : > { %v524_v37 = vmul.f32 %v1065_v36, %v1057_v17 }
 0x3e2   : > { %941 = vmatmul.msk.f32.vlgmr.msra.gmra.mxu2 %vm483_vm8, %v524_v37 }
 0x3e5   : > { %v656_v39 = vpop.xlane.xlu0 %655 }
 0x3e6   : > { %1066 = vrcp.f32 %v656_v39 }
 0x3ec   : > { %v1067_v43 = vpop.eup %1066 }
 0x3ed   : > { %v658_v47 = vmul.f32 %v1067_v43, %v1059_v25 }
 0x3ee   : > { %v723_v38 = vpop.xlane.xlu2 %722 }
 0x3f0   : > { %v727_v42 = vpop.permute.xlu1 %726 }
 0x3f6   : > { %v589_v40 = vpop.xlane.xlu2 %588 }
 0x3f7   : > { %1068 = vrcp.f32 %v589_v40 }
 0x3f8   : > { %v593_v41 = vpop.permute.xlu0 %592  ;;  %1070 = vrcp.f32 %v723_v38 }
 0x3f9   : > { %613 = vmatpush.msrb.mxu2 %v593_v41 }
 0x3fb   : > { %747 = vmatpush.msra.mxu2 %v727_v42 }
 0x3fd   : > { %v1069_v44 = vpop.eup %1068 }
 0x3fe   : > { %v660_v45 = vpop.permute.xlu2 %659  ;;  %v591_v46 = vmul.f32 %v1069_v44, %v1063_v33  ;;  %v1071_v48 = vpop.eup %1070 }
 0x3ff   : > { %680 = vmatpush.msrb.mxu3 %v660_v45  ;;  %v725_v49 = vmul.f32 %v1071_v48, %v1061_v31 }
 0x400   : > { %944 = vmatmul.msk.f32.vlgmr.msrb.gmra.mxu2 %vm483_vm8, %v591_v46  ;;  %947 = vmatmul.msk.f32.vlgmr.msrb.gmra.mxu3 %vm483_vm8, %v658_v47 }
 0x408   : > { %950 = vmatmul.msk.f32.vlgmr.msra.gmra.mxu2 %vm483_vm8, %v725_v49 }
 0x465   : > { %v548_v50 = vpop.f32.mrf.mxu2 }
 0x483   : > { %v615_v51 = vpop.f32.mrf.mxu2  ;;  %v682_v52 = vpop.f32.mrf.mxu3 }
 0x484   : > { %757 = vrot.lane.b32.xlu1 %v682_v52, %s1289_s11  ;;  %753 = vrot.lane.b32.xlu0 %v615_v51, %s1290_s22 }
 0x48b   : > { %v749_v53 = vpop.f32.mrf.mxu2 }
 0x48c   : > { %761 = vrot.lane.b32.xlu2 %v749_v53, %s1291_s17 }
 0x4e6   : > { %v762_v61 = vpop.permute.xlu2 %761 }
 0x4f6   : > { %v754_v58 = vpop.permute.xlu0 %753  ;;  %v758_v59 = vpop.permute.xlu1 %757 }
 0x4f7   : > { %v764_v60 = vsel %vm483_vm8, %v548_v50, %v754_v58 }
 0x4f8   : > { %v766_v62 = vsel %vm765_vm11, %v764_v60, %v758_v59 }
 0x4f9   : > { %v768_v63 = vsel %vm767_vm12, %v766_v62, %v762_v61 }
 0x4fa   : > { %951 = vmatmul.msk.f32.vlgmr.msra.gmra.mxu1 %vm394_vm0, %v768_v63 }
 0x577   : > { %v797_v2 = vpop.f32.mrf.mxu1 }
 0x578   : > { %v798_v3 = vadd.f32 %v1049_v1, %v797_v2 }
 0x57a   : > { %v800_v4 = vadd.f32 %v798_v3, %v1485_v0 }
 0x57c   : > { %801 = vst.msk [vmem:[%s390_s23] sm:$0xff] %vm394_vm0, %v800_v4 }
 0x57d   : > { %1219 = shalt.err (!%p1216_p8)
}
 0x57e   : > { %968 = dma.vmem_to_hbm [thread:$0]  (%p1408_p4), %s816_s25, 128, %s818_s20, %s803_s12  }
 0x57f PF: > { %s829_s22 = sand.u32 1, %s1258_s27   ;;  %p1621_p10 = scmp.ge.s32.totalorder %s1270_s30, 2 }
 0x580   : > { %s830_s17 = scalar_lea.sflag [#allocation4], %s829_s22 }
 0x581   : > { %p985_p13 = pnand %p1621_p10, %p1412_p6 }
 0x583   : > { %p986_p11 = pneg %p985_p13 }
 0x585   : > { %1253 = dma.done.wait (%p986_p11), %s830_s17, 128  }
 0x586   : > { %1255 = vsyncadd (%p986_p11), %s830_s17, 4294967168  ;;  %s1622_s30 = sld [smem:[#allocation17_spill]]  ;;  %s1625_s27 = smov %s1262_s28 }
 0x587   : > { %s1623_s10 = sld [smem:[#allocation16_spill]] }
 0x588   : > { %s1624_s29 = sld [smem:[#allocation18_spill]] }
 0x58c   : > { %p25_p0 = scmp.ge.s32.totalorder %s1622_s30, 4  }
 0x58d   : > { %s1626_s28 = smov %s1623_s10 }
 0x58e   :  { %27 = sbr.rel (!%p25_p0) target bundleno = 11 (0xb), region = 118 }
 0x593   :  { %836 = vsyncpa [#allocation3], 1 }
 0x594   :  { %838 = vsyncpa [#allocation3 + $0x1], 1 }
 0x595   :  { %839 = vsyncpa [#allocation6], 1 }
 0x596   :  { %841 = vsyncpa [#allocation6 + $0x1], 1 }
 0x597   :  { %842 = vsyncpa [#allocation9], 1 }
 0x598   :  { %843 = vsyncpa [#allocation4], 1 }
 0x599   :  { %845 = vsyncpa [#allocation4 + $0x1], 1 }

</bundles_post_ra>
